<compile_context>
chip_gen: v7x
topology: tpu7x:2x2x1
jax: 0.10.0
libtpu: 0.0.40
codegen_flags: <defaults>
</compile_context>

<pallas_src>
import functools

import jax
import jax.numpy as jnp
from jax.experimental import pallas as pl
from jax.experimental.pallas import tpu as pltpu


HEAD_PAD = 8   # sb1/sb2 weights packed into one native 8-sublane tile (rows 0/1 real)


def _round_up(x, m):
    return ((x + m - 1) // m) * m


def _cdiv(a, b):
    return -(-a // b)


def _default_num_cores():
    """2 TensorCores per Pallas device on v7x-style chips; 1 on v5e/v6e."""
    try:
        kind = jax.devices()[0].device_kind.lower()
    except Exception:
        return 1
    return 2 if "7" in kind else 1


def entity_net_kernel(x_ref, w_ref, b_ref, s1_ref, s2_ref, p_ref,
                      msum_ref, csum_ref, accm_ref, accc_ref,
                      *, n_tokens, tile, tiles_per_core):
    """One (core, token-tile) grid step.

    x:  [tile, H]  sent_encoder tokens (native dtype; tail block may be partial)
    w:  [8, H]     packed head weights (row0=sb1, row1=sb2, rows 2..7 zero pad)
    b:  [2, 1]     head biases (f32)
    s1/s2: [1, tile] f32 targets,  p: [1, tile] int32 token ids
    msum/csum: [1, 1] per-core partial outputs (written once, at the last step)
    accm/accc: [1, tile] f32 lane-parallel accumulators (VMEM scratch)
    """
    c = pl.program_id(0)
    j = pl.program_id(1)

    @pl.when(j == 0)
    def _init():
        accm_ref[...] = jnp.zeros_like(accm_ref)
        accc_ref[...] = jnp.zeros_like(accc_ref)

    x = x_ref[...]                                    # [tile, H]
    w = w_ref[...]                                    # [8, H]

    # Lane-dense logits: out[c, n] = sum_h w[c, h] * x[n, h]  -> [8, tile].
    # Both contraction dims are the lane dim (q@k.T pattern) -> MXU
    # transposed-push path, no XLU transpose of the big x tile.
    logits = jax.lax.dot_general(
        w, x, (((1,), (1,)), ((), ())),
        preferred_element_type=jnp.float32)           # [8, tile] f32

    b = b_ref[...]                                    # [2, 1]
    l1 = logits[0:1, :] + b[0:1, :]                   # [1, tile]
    l2 = logits[1:2, :] + b[1:2, :]                   # [1, tile]

    # Validity mask: real token (global col < N) AND passages != 0.  The tail
    # test must come from the in-kernel column index (not from p_ref), because
    # the OOB part of a partially-filled last block holds stale VMEM.
    tile_global = c * tiles_per_core + j              # logical (unclamped) tile
    col = tile_global * tile + jax.lax.broadcasted_iota(jnp.int32, (1, tile), 1)
    valid = jnp.logical_and(col < n_tokens, p_ref[...] != 0)     # [1, tile] bool

    def bce(z, t):
        # Numerically stable BCE-with-logits (matches torch.nn.BCEWithLogitsLoss):
        #   loss = max(z, 0) - z*t + log1p(exp(-|z|))
        return jnp.maximum(z, 0.0) - z * t + jnp.log1p(jnp.exp(-jnp.abs(z)))

    loss = bce(l1, s1_ref[...]) + bce(l2, s2_ref[...])           # [1, tile]

    # Select, not multiply: stale tail values can be NaN/Inf and NaN*0 = NaN.
    accm_ref[...] += jnp.where(valid, loss, 0.0)
    accc_ref[...] += jnp.where(valid, 1.0, 0.0)

    @pl.when(j == pl.num_programs(1) - 1)
    def _finalize():
        msum_ref[...] = jnp.sum(accm_ref[...], keepdims=True)
        csum_ref[...] = jnp.sum(accc_ref[...], keepdims=True)


def entity_net_loss(sent_encoder, passages, s1, s2, w1, b1, w2, b2,
                    *, tile_n=2048, num_cores=None):
    """sent_encoder: [B,S,H] (f32 or bf16), passages: [B,S] int, s1/s2: [B,S],
    w1/w2: [H], b1/b2: scalar.  Returns the scalar ent_loss."""
    B, S, H = sent_encoder.shape
    N = B * S
    x = sent_encoder.reshape(N, H)          # metadata-only; keep native dtype

    if num_cores is None:
        num_cores = _default_num_cores()

    # Token-dim tiling.  Either one full-extent block (always legal) or
    # 128-aligned tiles streamed over a ragged token dimension (no padding).
    tile_req = _round_up(max(int(tile_n), 128), 128)
    if _round_up(N, 128) <= tile_req:
        tile = N                            # single block == full array dims
    else:
        tile = tile_req                     # multiple of 128, strictly < N
    total_tiles = _cdiv(N, tile)
    num_cores = max(1, min(int(num_cores), total_tiles))
    tiles_per_core = _cdiv(total_tiles, num_cores)
    last_tile = total_tiles - 1

    # Tiny parameter packing (negligible HBM traffic).
    w8 = jnp.zeros((HEAD_PAD, H), dtype=x.dtype)
    w8 = w8.at[0].set(w1.astype(x.dtype)).at[1].set(w2.astype(x.dtype))
    bvec = jnp.stack([b1, b2]).astype(jnp.float32).reshape(2, 1)

    # Pure reshapes (no 8-row scatter, no padding pre-pass).
    s1r = s1.reshape(1, N).astype(jnp.float32)
    s2r = s2.reshape(1, N).astype(jnp.float32)
    p2 = passages.reshape(1, N).astype(jnp.int32)

    # Clamp block indices so every issued DMA starts in-bounds; phantom tiles
    # from the cores x tiles_per_core decomposition re-read the last tile and
    # are fully masked in-kernel via the unclamped column index.
    def x_map(c, j):
        return (jnp.minimum(c * tiles_per_core + j, last_tile), 0)

    def col_map(c, j):
        return (0, jnp.minimum(c * tiles_per_core + j, last_tile))

    def const_map(c, j):
        return (0, 0)

    itemsize = jnp.dtype(x.dtype).itemsize
    vmem_bytes = (
        2 * tile * H * itemsize             # x double-buffer (dominant stream)
        + 2 * HEAD_PAD * H * itemsize       # w (double-buffered, constant map)
        + 2 * 2 * 4                         # b
        + 3 * 2 * tile * 4                  # s1 / s2 / p double-buffered
        + 2 * HEAD_PAD * tile * 4           # accm/accc scratch (sublane-padded)
        + 4 * 2 * 4                         # (1,1) output blocks
    )
    vmem_limit = int(min(max(vmem_bytes + (4 << 20), 32 << 20), 120 << 20))

    cost = pl.CostEstimate(
        flops=2 * N * H * HEAD_PAD + 24 * N,
        transcendentals=4 * N,
        bytes_accessed=(N * H * itemsize + 12 * N
                        + HEAD_PAD * H * itemsize + 8 + 2 * num_cores * 8),
    )

    grid_spec = pltpu.PrefetchScalarGridSpec(
        num_scalar_prefetch=0,
        grid=(num_cores, tiles_per_core),
        in_specs=[
            pl.BlockSpec((tile, H), x_map),          # x  (native dtype)
            pl.BlockSpec((HEAD_PAD, H), const_map),  # w8
            pl.BlockSpec((2, 1), const_map),         # bias
            pl.BlockSpec((1, tile), col_map),        # s1
            pl.BlockSpec((1, tile), col_map),        # s2
            pl.BlockSpec((1, tile), col_map),        # passages
        ],
        out_specs=[
            pl.BlockSpec((1, 1), lambda c, j: (c, 0)),
            pl.BlockSpec((1, 1), lambda c, j: (c, 0)),
        ],
        scratch_shapes=[
            pltpu.VMEM((1, tile), jnp.float32),      # masked-bce accumulator
            pltpu.VMEM((1, tile), jnp.float32),      # mask-count accumulator
        ],
    )

    kernel = functools.partial(
        entity_net_kernel, n_tokens=N, tile=tile, tiles_per_core=tiles_per_core)

    msum, csum = pl.pallas_call(
        kernel,
        out_shape=(jax.ShapeDtypeStruct((num_cores, 1), jnp.float32),
                   jax.ShapeDtypeStruct((num_cores, 1), jnp.float32)),
        grid_spec=grid_spec,
        compiler_params=pltpu.CompilerParams(
            dimension_semantics=("parallel", "arbitrary"),
            vmem_limit_bytes=vmem_limit),
        cost_estimate=cost,
    )(x, w8, bvec, s1r, s2r, p2)

    # NOTE: division is unguarded (NaN for an all-padding batch) to match the
    # reference PyTorch semantics exactly.
    return jnp.sum(msum) / jnp.sum(csum)


def entity_net_loss_ref(sent_encoder, passages, s1, s2, w1, b1, w2, b2):
    """Pure-JAX reference mirroring the PyTorch forward (training branch)."""
    mask = (passages != 0).astype(jnp.float32)
    sb1 = jnp.einsum("bsh,h->bs", sent_encoder.astype(jnp.float32), w1) + b1
    sb2 = jnp.einsum("bsh,h->bs", sent_encoder.astype(jnp.float32), w2) + b2

    def bce(x, t):
        return jnp.maximum(x, 0.0) - x * t + jnp.log1p(jnp.exp(-jnp.abs(x)))

    msum = jnp.sum(mask)
    l1 = jnp.sum(bce(sb1, s1) * mask) / msum
    l2 = jnp.sum(bce(sb2, s2) * mask) / msum
    return l1 + l2


# TODO(synk): the is_eval=True branch (EntityNET.predict) is host-side Python
# post-processing over variable-length contexts and has no Pallas equivalent.

if __name__ == "__main__":
    key = jax.random.PRNGKey(0)

    def make_inputs(key, B, S, H):
        k_x, k_w1, k_b1, k_w2, k_b2, k_s1, k_s2, k_p = jax.random.split(key, 8)
        sent_encoder = jax.random.normal(k_x, (B, S, H), dtype=jnp.float32)
        bound = 1.0 / jnp.sqrt(H)
        w1 = jax.random.uniform(k_w1, (H,), minval=-bound, maxval=bound, dtype=jnp.float32)
        b1 = jax.random.uniform(k_b1, (), minval=-bound, maxval=bound, dtype=jnp.float32)
        w2 = jax.random.uniform(k_w2, (H,), minval=-bound, maxval=bound, dtype=jnp.float32)
        b2 = jax.random.uniform(k_b2, (), minval=-bound, maxval=bound, dtype=jnp.float32)
        s1 = (jax.random.uniform(k_s1, (B, S)) > 0.8).astype(jnp.float32)
        s2 = (jax.random.uniform(k_s2, (B, S)) > 0.8).astype(jnp.float32)
        passages = jax.random.randint(k_p, (B, S), 0, 5, dtype=jnp.int32)
        passages = passages.at[:, 0].set(101)   # guarantee a non-empty mask
        return sent_encoder, passages, s1, s2, w1, b1, w2, b2

    # Test 1: tiny shapes (single full-extent block path), default tiling.
    k1, k2 = jax.random.split(key)
    args1 = make_inputs(k1, B=2, S=8, H=32)
    loss1 = jax.block_until_ready(entity_net_loss(*args1))
    ref1 = entity_net_loss_ref(*args1)
    assert jnp.allclose(loss1, ref1, rtol=1e-5, atol=1e-5), (loss1, ref1)

    # Test 2: ragged token dim (N=1234, tile=256 -> partial tail block) plus a
    # forced 2-core grid decomposition with a clamped phantom tile.
    args2 = make_inputs(k2, B=2, S=617, H=64)
    loss2 = jax.block_until_ready(
        entity_net_loss(*args2, tile_n=256, num_cores=2))
    ref2 = entity_net_loss_ref(*args2)
    assert jnp.allclose(loss2, ref2, rtol=1e-4, atol=1e-4), (loss2, ref2)

    print("KERNEL_OK")
</pallas_src>

<mosaic_0001>
module attributes {stable_mosaic.version = 11 : i64} {
  func.func @entity_net_kernel(%arg0: i32, %arg1: i32, %arg2: memref<16x32xf32, #tpu.memory_space<vmem>>, %arg3: memref<8x32xf32, #tpu.memory_space<vmem>>, %arg4: memref<2x1xf32, #tpu.memory_space<vmem>>, %arg5: memref<1x16xf32, #tpu.memory_space<vmem>>, %arg6: memref<1x16xf32, #tpu.memory_space<vmem>>, %arg7: memref<1x16xi32, #tpu.memory_space<vmem>>, %arg8: memref<1x1xf32, #tpu.memory_space<vmem>>, %arg9: memref<1x1xf32, #tpu.memory_space<vmem>>, %arg10: memref<1x16xf32, #tpu.memory_space<vmem>>, %arg11: memref<1x16xf32, #tpu.memory_space<vmem>>) attributes {dimension_semantics = [#tpu.dimension_semantics<parallel>, #tpu.dimension_semantics<arbitrary>], iteration_bounds = array<i64: 1, 1>, scalar_prefetch = 0 : i64, scratch_operands = 2 : i64, tpu.core_type = #tpu.core_type<tc>, window_params = [{transform_indices = @transform_0, window_bounds = array<i64: 16, 32>}, {pipeline_mode = #tpu.pipeline_mode<synchronous>, transform_indices = @transform_1, window_bounds = array<i64: 8, 32>}, {pipeline_mode = #tpu.pipeline_mode<synchronous>, transform_indices = @transform_2, window_bounds = array<i64: 2, 1>}, {transform_indices = @transform_3, window_bounds = array<i64: 1, 16>}, {transform_indices = @transform_4, window_bounds = array<i64: 1, 16>}, {transform_indices = @transform_5, window_bounds = array<i64: 1, 16>}, {transform_indices = @transform_6, window_bounds = array<i64: 1, 1>}, {transform_indices = @transform_7, window_bounds = array<i64: 1, 1>}]} {
    %c0_i32 = arith.constant 0 : i32
    %0 = arith.cmpi eq, %arg1, %c0_i32 : i32
    %1 = arith.extui %0 : i1 to i32
    %c0_i32_0 = arith.constant 0 : i32
    %2 = arith.cmpi ne, %1, %c0_i32_0 : i32
    scf.if %2 {
      %cst_31 = arith.constant 0.000000e+00 : f32
      %64 = vector.broadcast %cst_31 : f32 to vector<1x16xf32>
      %c0_32 = arith.constant 0 : index
      %c0_33 = arith.constant 0 : index
      %65 = vector.load %arg10[%c0_32, %c0_33] : memref<1x16xf32, #tpu.memory_space<vmem>>, vector<1x16xf32>
      tpu.vector_store %arg10[%c0_32, %c0_33], %64 {strides = array<i32>} : memref<1x16xf32, #tpu.memory_space<vmem>>, vector<1x16xf32>,
      %cst_34 = arith.constant 0.000000e+00 : f32
      %66 = vector.broadcast %cst_34 : f32 to vector<1x16xf32>
      %c0_35 = arith.constant 0 : index
      %c0_36 = arith.constant 0 : index
      %67 = vector.load %arg11[%c0_35, %c0_36] : memref<1x16xf32, #tpu.memory_space<vmem>>, vector<1x16xf32>
      tpu.vector_store %arg11[%c0_35, %c0_36], %66 {strides = array<i32>} : memref<1x16xf32, #tpu.memory_space<vmem>>, vector<1x16xf32>,
    } else {
    }
    %c0 = arith.constant 0 : index
    %c0_1 = arith.constant 0 : index
    %3 = vector.load %arg2[%c0, %c0_1] : memref<16x32xf32, #tpu.memory_space<vmem>>, vector<16x32xf32>
    %c0_2 = arith.constant 0 : index
    %c0_3 = arith.constant 0 : index
    %4 = vector.load %arg3[%c0_2, %c0_3] : memref<8x32xf32, #tpu.memory_space<vmem>>, vector<8x32xf32>
    %cst = arith.constant dense<0.000000e+00> : vector<8x16xf32>
    %5 = tpu.matmul %4, %3, %cst {dimension_numbers = #tpu.dot_dimension_numbers<[1], [1], [0], [0], [0, 0, 1, 0], [], []>} : vector<8x32xf32>, vector<16x32xf32>, vector<8x16xf32> -> vector<8x16xf32>
    %c0_4 = arith.constant 0 : index
    %c0_5 = arith.constant 0 : index
    %6 = vector.load %arg4[%c0_4, %c0_5] : memref<2x1xf32, #tpu.memory_space<vmem>>, vector<2x1xf32>
    %7 = vector.extract_strided_slice %5 {offsets = [0, 0], sizes = [1, 16], strides = [1, 1]} : vector<8x16xf32> to vector<1x16xf32>
    %8 = vector.extract_strided_slice %6 {offsets = [0, 0], sizes = [1, 1], strides = [1, 1]} : vector<2x1xf32> to vector<1x1xf32>
    %9 = vector.broadcast %8 : vector<1x1xf32> to vector<1x16xf32>
    %10 = arith.addf %7, %9 : vector<1x16xf32>
    %11 = vector.extract_strided_slice %5 {offsets = [1, 0], sizes = [1, 16], strides = [1, 1]} : vector<8x16xf32> to vector<1x16xf32>
    %12 = vector.extract_strided_slice %6 {offsets = [1, 0], sizes = [1, 1], strides = [1, 1]} : vector<2x1xf32> to vector<1x1xf32>
    %13 = vector.broadcast %12 : vector<1x1xf32> to vector<1x16xf32>
    %14 = arith.addf %11, %13 : vector<1x16xf32>
    %c1_i32 = arith.constant 1 : i32
    %15 = arith.muli %arg0, %c1_i32 : i32
    %16 = arith.addi %15, %arg1 : i32
    %c16_i32 = arith.constant 16 : i32
    %17 = arith.muli %16, %c16_i32 : i32
    %18 = tpu.iota {dimensions = array<i32: 1>} : vector<1x16xi32>
    %19 = vector.broadcast %17 : i32 to vector<1x16xi32>
    %20 = arith.addi %19, %18 : vector<1x16xi32>
    %c16_i32_6 = arith.constant 16 : i32
    %21 = vector.broadcast %c16_i32_6 : i32 to vector<1x16xi32>
    %22 = arith.cmpi slt, %20, %21 : vector<1x16xi32>
    %c0_7 = arith.constant 0 : index
    %c0_8 = arith.constant 0 : index
    %23 = vector.load %arg7[%c0_7, %c0_8] : memref<1x16xi32, #tpu.memory_space<vmem>>, vector<1x16xi32>
    %c0_i32_9 = arith.constant 0 : i32
    %24 = vector.broadcast %c0_i32_9 : i32 to vector<1x16xi32>
    %25 = arith.cmpi ne, %23, %24 : vector<1x16xi32>
    %26 = arith.andi %22, %25 : vector<1x16xi1>
    %c0_10 = arith.constant 0 : index
    %c0_11 = arith.constant 0 : index
    %27 = vector.load %arg5[%c0_10, %c0_11] : memref<1x16xf32, #tpu.memory_space<vmem>>, vector<1x16xf32>
    %cst_12 = arith.constant 0.000000e+00 : f32
    %28 = vector.broadcast %cst_12 : f32 to vector<1x16xf32>
    %29 = arith.maximumf %10, %28 : vector<1x16xf32>
    %30 = arith.mulf %10, %27 : vector<1x16xf32>
    %31 = arith.subf %29, %30 : vector<1x16xf32>
    %32 = math.absf %10 : vector<1x16xf32>
    %cst_13 = arith.constant 0.000000e+00 : f32
    %33 = vector.broadcast %cst_13 : f32 to vector<1x16xf32>
    %34 = arith.subf %33, %32 : vector<1x16xf32>
    %35 = math.exp %34 : vector<1x16xf32>
    %36 = math.log1p %35 : vector<1x16xf32>
    %37 = arith.addf %31, %36 : vector<1x16xf32>
    %c0_14 = arith.constant 0 : index
    %c0_15 = arith.constant 0 : index
    %38 = vector.load %arg6[%c0_14, %c0_15] : memref<1x16xf32, #tpu.memory_space<vmem>>, vector<1x16xf32>
    %cst_16 = arith.constant 0.000000e+00 : f32
    %39 = vector.broadcast %cst_16 : f32 to vector<1x16xf32>
    %40 = arith.maximumf %14, %39 : vector<1x16xf32>
    %41 = arith.mulf %14, %38 : vector<1x16xf32>
    %42 = arith.subf %40, %41 : vector<1x16xf32>
    %43 = math.absf %14 : vector<1x16xf32>
    %cst_17 = arith.constant 0.000000e+00 : f32
    %44 = vector.broadcast %cst_17 : f32 to vector<1x16xf32>
    %45 = arith.subf %44, %43 : vector<1x16xf32>
    %46 = math.exp %45 : vector<1x16xf32>
    %47 = math.log1p %46 : vector<1x16xf32>
    %48 = arith.addf %42, %47 : vector<1x16xf32>
    %49 = arith.addf %37, %48 : vector<1x16xf32>
    %c0_18 = arith.constant 0 : index
    %c0_19 = arith.constant 0 : index
    %50 = vector.load %arg10[%c0_18, %c0_19] : memref<1x16xf32, #tpu.memory_space<vmem>>, vector<1x16xf32>
    %cst_20 = arith.constant 0.000000e+00 : f32
    %51 = vector.broadcast %cst_20 : f32 to vector<1x16xf32>
    %52 = arith.select %26, %49, %51 : vector<1x16xi1>, vector<1x16xf32>
    %53 = arith.addf %50, %52 : vector<1x16xf32>
    %c0_21 = arith.constant 0 : index
    %c0_22 = arith.constant 0 : index
    %54 = vector.load %arg10[%c0_21, %c0_22] : memref<1x16xf32, #tpu.memory_space<vmem>>, vector<1x16xf32>
    tpu.vector_store %arg10[%c0_21, %c0_22], %53 {strides = array<i32>} : memref<1x16xf32, #tpu.memory_space<vmem>>, vector<1x16xf32>,
    %c0_23 = arith.constant 0 : index
    %c0_24 = arith.constant 0 : index
    %55 = vector.load %arg11[%c0_23, %c0_24] : memref<1x16xf32, #tpu.memory_space<vmem>>, vector<1x16xf32>
    %cst_25 = arith.constant 1.000000e+00 : f32
    %cst_26 = arith.constant 0.000000e+00 : f32
    %56 = vector.broadcast %cst_25 : f32 to vector<1x16xf32>
    %57 = vector.broadcast %cst_26 : f32 to vector<1x16xf32>
    %58 = arith.select %26, %56, %57 : vector<1x16xi1>, vector<1x16xf32>
    %59 = arith.addf %55, %58 : vector<1x16xf32>
    %c0_27 = arith.constant 0 : index
    %c0_28 = arith.constant 0 : index
    %60 = vector.load %arg11[%c0_27, %c0_28] : memref<1x16xf32, #tpu.memory_space<vmem>>, vector<1x16xf32>
    tpu.vector_store %arg11[%c0_27, %c0_28], %59 {strides = array<i32>} : memref<1x16xf32, #tpu.memory_space<vmem>>, vector<1x16xf32>,
    %c0_i32_29 = arith.constant 0 : i32
    %61 = arith.cmpi eq, %arg1, %c0_i32_29 : i32
    %62 = arith.extui %61 : i1 to i32
    %c0_i32_30 = arith.constant 0 : i32
    %63 = arith.cmpi ne, %62, %c0_i32_30 : i32
    scf.if %63 {
      %c0_31 = arith.constant 0 : index
      %c0_32 = arith.constant 0 : index
      %64 = vector.load %arg10[%c0_31, %c0_32] : memref<1x16xf32, #tpu.memory_space<vmem>>, vector<1x16xf32>
      %65 = vector.shape_cast %64 : vector<1x16xf32> to vector<1x1x16xf32>
      %cst_33 = arith.constant dense<0.000000e+00> : vector<1xf32>
      %66 = vector.multi_reduction <add>, %65, %cst_33 [1, 2] : vector<1x1x16xf32> to vector<1xf32>
      %67 = vector.shape_cast %66 : vector<1xf32> to vector<1x1x1xf32>
      %68 = vector.extract %67[0, 0, 0] : f32 from vector<1x1x1xf32>
      %69 = vector.broadcast %68 : f32 to vector<1x1xf32>
      %c0_34 = arith.constant 0 : index
      %c0_35 = arith.constant 0 : index
      %70 = vector.load %arg8[%c0_34, %c0_35] : memref<1x1xf32, #tpu.memory_space<vmem>>, vector<1x1xf32>
      tpu.vector_store %arg8[%c0_34, %c0_35], %69 {strides = array<i32>} : memref<1x1xf32, #tpu.memory_space<vmem>>, vector<1x1xf32>,
      %c0_36 = arith.constant 0 : index
      %c0_37 = arith.constant 0 : index
      %71 = vector.load %arg11[%c0_36, %c0_37] : memref<1x16xf32, #tpu.memory_space<vmem>>, vector<1x16xf32>
      %72 = vector.shape_cast %71 : vector<1x16xf32> to vector<1x1x16xf32>
      %cst_38 = arith.constant dense<0.000000e+00> : vector<1xf32>
      %73 = vector.multi_reduction <add>, %72, %cst_38 [1, 2] : vector<1x1x16xf32> to vector<1xf32>
      %74 = vector.shape_cast %73 : vector<1xf32> to vector<1x1x1xf32>
      %75 = vector.extract %74[0, 0, 0] : f32 from vector<1x1x1xf32>
      %76 = vector.broadcast %75 : f32 to vector<1x1xf32>
      %c0_39 = arith.constant 0 : index
      %c0_40 = arith.constant 0 : index
      %77 = vector.load %arg9[%c0_39, %c0_40] : memref<1x1xf32, #tpu.memory_space<vmem>>, vector<1x1xf32>
      tpu.vector_store %arg9[%c0_39, %c0_40], %76 {strides = array<i32>} : memref<1x1xf32, #tpu.memory_space<vmem>>, vector<1x1xf32>,
    } else {
    }
    return
  }
  func.func @transform_0(%arg0: i32, %arg1: i32) -> (i32, i32) {
    %c1_i32 = arith.constant 1 : i32
    %0 = arith.muli %arg0, %c1_i32 : i32
    %1 = arith.addi %0, %arg1 : i32
    %c0_i32 = arith.constant 0 : i32
    %2 = arith.minsi %1, %c0_i32 : i32
    %c0_i32_0 = arith.constant 0 : i32
    %c0_i32_1 = arith.constant 0 : i32
    return %2, %c0_i32_0 : i32, i32
  }
  func.func @transform_1(%arg0: i32, %arg1: i32) -> (i32, i32) {
    %c0_i32 = arith.constant 0 : i32
    %c0_i32_0 = arith.constant 0 : i32
    %c0_i32_1 = arith.constant 0 : i32
    return %c0_i32, %c0_i32_0 : i32, i32
  }
  func.func @transform_2(%arg0: i32, %arg1: i32) -> (i32, i32) {
    %c0_i32 = arith.constant 0 : i32
    %c0_i32_0 = arith.constant 0 : i32
    %c0_i32_1 = arith.constant 0 : i32
    return %c0_i32, %c0_i32_0 : i32, i32
  }
  func.func @transform_3(%arg0: i32, %arg1: i32) -> (i32, i32) {
    %c1_i32 = arith.constant 1 : i32
    %0 = arith.muli %arg0, %c1_i32 : i32
    %1 = arith.addi %0, %arg1 : i32
    %c0_i32 = arith.constant 0 : i32
    %2 = arith.minsi %1, %c0_i32 : i32
    %c0_i32_0 = arith.constant 0 : i32
    %c0_i32_1 = arith.constant 0 : i32
    return %c0_i32_0, %2 : i32, i32
  }
  func.func @transform_4(%arg0: i32, %arg1: i32) -> (i32, i32) {
    %c1_i32 = arith.constant 1 : i32
    %0 = arith.muli %arg0, %c1_i32 : i32
    %1 = arith.addi %0, %arg1 : i32
    %c0_i32 = arith.constant 0 : i32
    %2 = arith.minsi %1, %c0_i32 : i32
    %c0_i32_0 = arith.constant 0 : i32
    %c0_i32_1 = arith.constant 0 : i32
    return %c0_i32_0, %2 : i32, i32
  }
  func.func @transform_5(%arg0: i32, %arg1: i32) -> (i32, i32) {
    %c1_i32 = arith.constant 1 : i32
    %0 = arith.muli %arg0, %c1_i32 : i32
    %1 = arith.addi %0, %arg1 : i32
    %c0_i32 = arith.constant 0 : i32
    %2 = arith.minsi %1, %c0_i32 : i32
    %c0_i32_0 = arith.constant 0 : i32
    %c0_i32_1 = arith.constant 0 : i32
    return %c0_i32_0, %2 : i32, i32
  }
  func.func @transform_6(%arg0: i32, %arg1: i32) -> (i32, i32) {
    %c0_i32 = arith.constant 0 : i32
    %c0_i32_0 = arith.constant 0 : i32
    return %arg0, %c0_i32 : i32, i32
  }
  func.func @transform_7(%arg0: i32, %arg1: i32) -> (i32, i32) {
    %c0_i32 = arith.constant 0 : i32
    %c0_i32_0 = arith.constant 0 : i32
    return %arg0, %c0_i32 : i32, i32
  }
}

</mosaic_0001>

<bundles_post_ra>
// kernel: tpu_custom_call.1
= control target key start
LH: loop header
LB: loop body
LE: loop exit
PB: predicated region body
PF: predicated region fallthrough
CT: control target
= control target key end

     0   :  { %13 = vsyncpa [#allocation5], 0  ;;  %s624_s0 = inlined_call_operand.hbm [shape: f32[16,32], index: 0, kind: input, shape index: {}]   ;;  %s625_s1 = inlined_call_operand.hbm [shape: f32[8,32], index: 1, kind: input, shape index: {}]   ;;  %s626_s2 = inlined_call_operand.vmem [shape: f32[2,1], index: 2, kind: input, shape index: {}]   ;;  %s627_s3 = inlined_call_operand.vmem [shape: f32[1,16], index: 3, kind: input, shape index: {}]   ;;  %s628_s4 = inlined_call_operand.vmem [shape: f32[1,16], index: 4, kind: input, shape index: {}]   ;;  %s629_s5 = inlined_call_operand.vmem [shape: s32[1,16], index: 5, kind: input, shape index: {}]   ;;  %s630_s6 = inlined_call_operand.hbm [shape: f32[1,1], index: 6, kind: output, shape index: {0}]   ;;  %s631_s7 = inlined_call_operand.hbm [shape: f32[1,1], index: 7, kind: output, shape index: {1}]  }
   0x1   :  { %14 = vsyncpa [#allocation8], 0 }
   0x2   :  { %15 = vsyncpa [#allocation6], 0 }
   0x3   :  { %16 = vsyncpa [#allocation11], 0  ;;  %s487_s24 = smov [#allocation4]   ;;  %s391_s28 = scalar_lea.hbm %s624_s0, 256 }
   0x4   :  { %s28_s25 = sshll.u32 %s487_s24, 4  ;;  %p392_p0 = scmp.ne.s32.totalorder %s624_s0, %s391_s28  ;;  %s29_s25 = int_to_ptr.vmem [resolvable:$true] %s28_s25 }
   0x5   :  { %p395_p1 = scmp.lt.u32.totalorder %s391_s28, %s624_s0 }
   0x7   :  { %p397_p2 = pnand %p395_p1, %p392_p0 }
   0x9   :  { %400 = shalt.err (!%p397_p2)
}
   0xa   :  { %s401_s10 = scalar_lea.vmem %s29_s25, 256  ;;  %p406_p4 = scmp.lt.s32.totalorder %s29_s25, %s29_s25 }
   0xb   :  { %p402_p3 = scmp.ne.s32.totalorder %s29_s25, %s401_s10  ;;  %p407_p5 = scmp.lt.s32.totalorder %s401_s10, %s401_s10 }
   0xd   :  { %p408_p6 = por %p407_p5, %p406_p4 }
   0xf   :  { %p409_p7 = pnand %p408_p6, %p402_p3 }
  0x11   :  { %412 = shalt.err (!%p409_p7)
}
  0x12   :  { %s488_s11 = smov 128   ;;  %s489_s12 = smov 8  }
  0x13   :  { %34 = dma.hbm_to_vmem [thread:$0]  %s624_s0, 256, %s29_s25, [#allocation5], %s488_s11, %s488_s11, %s489_s12  }
  0x14   :  { %s490_s15 = smov [#allocation7]   ;;  %s413_s19 = scalar_lea.hbm %s625_s1, 128 }
  0x15   :  { %s41_s16 = sshll.u32 %s490_s15, 4  ;;  %p414_p8 = scmp.ne.s32.totalorder %s625_s1, %s413_s19  ;;  %s42_s16 = int_to_ptr.vmem [resolvable:$true] %s41_s16 }
  0x16   :  { %p417_p9 = scmp.lt.u32.totalorder %s413_s19, %s625_s1 }
  0x18   :  { %p419_p10 = pnand %p417_p9, %p414_p8 }
  0x1a   :  { %422 = shalt.err (!%p419_p10)
}
  0x1b   :  { %s423_s24 = scalar_lea.vmem %s42_s16, 128  ;;  %p428_p12 = scmp.lt.s32.totalorder %s42_s16, %s42_s16 }
  0x1c   :  { %p424_p11 = scmp.ne.s32.totalorder %s42_s16, %s423_s24  ;;  %p429_p13 = scmp.lt.s32.totalorder %s423_s24, %s423_s24 }
  0x1e   :  { %p430_p0 = por %p429_p13, %p428_p12 }
  0x20   :  { %p431_p1 = pnand %p430_p0, %p424_p11 }
  0x22   :  { %434 = shalt.err (!%p431_p1)
}
  0x23   :  { %44 = dma.hbm_to_vmem [thread:$0]  %s625_s1, 128, %s42_s16, [#allocation8]  }
  0x24   :  { %479 = dma.done.wait [#allocation5], 256  }
  0x25   :  { %480 = vsyncadd [#allocation5], 4294967040 }
  0x26   :  { %481 = dma.done.wait [#allocation8], 128  }
  0x27   :  { %482 = vsyncadd [#allocation8], 4294967168  ;;  %vm139_vm0 = vcmask 122880   ;;  %v491_v0 = vmov 0.0|0.0   ;;  %v492_v1 = vmov 0.0   ;;  %v234_v2 = vlaneseq  ;;  %v142_v5 = vld [vmem:[#allocation4] sm:$0xff] }
  0x28   :  { %368 = vmatprep.subr.bf16.mxu0 %v491_v0  ;;  %140 = vst.msk [vmem:[#allocation2] sm:$0x1] %vm139_vm0, %v492_v1  ;;  %141 = vst.msk [vmem:[#allocation3] sm:$0x1] %vm139_vm0, %v492_v1  ;;  %vm493_vm1 = vmmov 0   ;;  %v494_v3 = vmov 0  }
  0x29   :  { %365 = vmatprep.mubr.msk.f32.mxu0 %vm493_vm1, %v492_v1  ;;  %386 = vset.pattern.permute.xlu0 %v494_v3  ;;  %vm145_vm2 = vcmask 261120   ;;  %v235_v4 = vand.u32 127, %v234_v2  ;;  %v143_v6 = vld [vmem:[#allocation4 + $0x8] sm:$0xff]  ;;  %v239_v7 = vld [vmem:[%s629_s5] sm:$0x1]  ;;  %v144_v14 = vld [vmem:[#allocation7] sm:$0xff] }
  0x2a   :  { %vm370_vm3 = vmpackc.low %vm145_vm2, %vm145_vm2  ;;  %v369_v8 = vpack.c.bf16 %v143_v6, %v142_v5  ;;  %vm240_vm5 = vcmp.ne.s32.totalorder %v239_v7, 0  ;;  %v225_v10 = vld [vmem:[%s626_s2] sm:$0x3]  ;;  %s496_s8 = smov [#allocation10]   ;;  %vm298_vm8 = vcmask 0  }
  0x2b   :  { %vm238_vm4 = vcmp.lt.s32.totalorder %v235_v4, 16  ;;  %228 = vperm.xlu0 %386, %v225_v10   ;;  %v357_v27 = vld [vmem:[%s628_s4] ss:$0 sm:$0xff]  ;;  %s329_s9 = sshll.u32 %s496_s8, 4  ;;  %s590_s9 = int_to_ptr.vmem [resolvable:$true] %s329_s9 }
  0x2c   :  { %vm571_vm6 = vmand %vm238_vm4, %vm240_vm5  ;;  %371 = vmatpush3.bf16.xpose.msk.msra.mxu0 %vm370_vm3, %v369_v8  ;;  %v242_v28 = vld [vmem:[%s627_s3] sm:$0x1]  ;;  %s495_s3 = smov [#allocation9]  }
  0x2d   :  { %v280_v12 = vsel %vm571_vm6, 1.0, %v492_v1  ;;  %s319_s4 = sshll.u32 %s495_s3, 4  ;;  %s320_s4 = int_to_ptr.vmem [resolvable:$true] %s319_s4 }
  0x2e   :  { %s435_s12 = scalar_lea.vmem %s320_s4, 16  ;;  %s439_s13 = scalar_lea.vmem %s320_s4, 32 }
  0x2f   :  { %v279_v9 = vld [vmem:[#allocation3] sm:$0x1]  ;;  %v274_v44 = vld [vmem:[#allocation2] sm:$0x1]  ;;  %p436_p2 = scmp.ne.s32.totalorder %s320_s4, %s435_s12  ;;  %p440_p3 = scmp.lt.s32.totalorder %s320_s4, %s320_s4 }
  0x30   :  { %v281_v13 = vadd.f32 %v280_v12, %v279_v9  ;;  %p441_p4 = scmp.lt.s32.totalorder %s439_s13, %s435_s12 }
  0x32   :  { %282 = vst.msk [vmem:[#allocation3] sm:$0x1] %vm139_vm0, %v281_v13  ;;  %p442_p5 = por %p441_p4, %p440_p3 }
  0x33   :  { %366 = vmatmul.mubr.msk.f32.vlgmr.msra.gmra.mrb[0].mxu0 %vm145_vm2, %v144_v14 }
  0x34   :  { %p443_p6 = pnand %p442_p5, %p436_p2 }
  0x39   :  { %v300_v15 = vld [vmem:[#allocation3] sm:$0x1] }
  0x3a   :  { %v301_v16 = vsel %vm139_vm0, %v300_v15, 0.0 }
  0x3b   :  { %302 = vadd.xlane.f32.xlu1 %v301_v16 }
  0xaa   :  { %v229_v17 = vpop.permute.xlu0 %228 }
  0xc8   :  { %v303_v49 = vpop.xlane.xlu1 %302 }
  0xc9   :  { %v304_v50 = vrot.slane %v303_v49, 4 }
  0xcb   :  { %v305_v51 = vadd.f32 %v304_v50, %v303_v49 }
  0xcd   :  { %v306_v52 = vrot.slane %v305_v51, 2 }
  0xcf   :  { %v307_v56 = vadd.f32 %v306_v52, %v305_v51 }
  0xd1   :  { %v308_v59 = vrot.slane %v307_v56, 1 }
  0xd3   :  { %v309_v62 = vadd.f32 %v308_v59, %v307_v56 }
 0x106   :  { %v221_v18 = vpop.f32.mrb[0].mxu0 }
 0x107   :  { %v231_v19 = vadd.f32 %v229_v17, %v221_v18  ;;  %v367_v20 = vpop.f32.mrb[1].mxu0 }
 0x109   :  { %v246_v21 = vand.u32 2147483647, %v231_v19  ;;  %v243_v30 = vmax.f32 %v231_v19, 0.0  ;;  %v267_v32 = vmul.f32 %v357_v27, %v231_v19  ;;  %v244_v34 = vmul.f32 %v242_v28, %v231_v19 }
 0x10b   :  { %v247_v22 = vsub.f32 0.0, %v246_v21  ;;  %v268_v37 = vsub.f32 %v243_v30, %v267_v32  ;;  %v245_v39 = vsub.f32 %v243_v30, %v244_v34 }
 0x10d   :  { %v248_v23 = vmul.f32 1.442695, %v247_v22 }
 0x10f   :  { %387 = vpow2.f32 %v248_v23 }
 0x119   :  { %v388_v24 = vpop.eup %387 }
 0x11a   :  { %v250_v25 = vadd.f32 1.0, %v388_v24  ;;  %v253_v26 = vmul.f32 -0.5, %v388_v24  ;;  %v256_v31 = vand.u32 2147483647, %v388_v24 }
 0x11c   :  { %389 = vlog2.f32 %v250_v25  ;;  %v254_v29 = vadd.f32 1.0, %v253_v26  ;;  %vm257_vm7 = vcmp.lt.f32.partialorder %v256_v31, 0.0004427343 }
 0x11e   :  { %v255_v36 = vmul.f32 %v388_v24, %v254_v29 }
 0x126   :  { %v390_v33 = vpop.eup %389 }
 0x127   :  { %v252_v35 = vmul.f32 0.6931472, %v390_v33 }
 0x129   :  { %v258_v38 = vsel %vm257_vm7, %v255_v36, %v252_v35 }
 0x12a   :  { %v269_v40 = vadd.f32 %v268_v37, %v258_v38  ;;  %v259_v41 = vadd.f32 %v258_v38, %v245_v39 }
 0x12c   :  { %v271_v42 = vrot.slane %v269_v40, 1 }
 0x12e   :  { %v273_v43 = vadd.f32 %v271_v42, %v259_v41 }
 0x130   :  { %v275_v45 = vsel %vm571_vm6, %v273_v43, 0.0 }
 0x131   :  { %v276_v46 = vadd.f32 %v275_v45, %v274_v44 }
 0x133   :  { %278 = vst.msk [vmem:[#allocation2] sm:$0x1] %vm139_vm0, %v276_v46 }
 0x13a   :  { %v286_v47 = vld [vmem:[#allocation2] sm:$0x1] }
 0x13b   :  { %v287_v48 = vsel %vm139_vm0, %v286_v47, 0.0 }
 0x13c   :  { %288 = vadd.xlane.f32.xlu0 %v287_v48 }
 0x1c9   :  { %v289_v53 = vpop.xlane.xlu0 %288 }
 0x1ca   :  { %v290_v54 = vrot.slane %v289_v53, 4 }
 0x1cc   :  { %v291_v55 = vadd.f32 %v290_v54, %v289_v53 }
 0x1ce   :  { %v292_v57 = vrot.slane %v291_v55, 2 }
 0x1d0   :  { %v293_v58 = vadd.f32 %v292_v57, %v291_v55 }
 0x1d2   :  { %v294_v60 = vrot.slane %v293_v58, 1 }
 0x1d4   :  { %v295_v61 = vadd.f32 %v294_v60, %v293_v58 }
 0x1d6   :  { %372 = vpush %v295_v61 }
 0x1d7   :  { %374 = vpush %v309_v62 }
 0x207   :  { %s373_s10 = spop %372 }
 0x208   :  { %v297_v63 = vstv %s373_s10  ;;  %s375_s11 = spop %374 }
 0x209   :  { %v311_v0 = vstv %s375_s11  ;;  %299 = vst.msk [vmem:[#allocation9] sm:$0x1] %vm298_vm8, %v297_v63 }
 0x20a   :  { %446 = shalt.err (!%p443_p6)
}
 0x20b   :  { %s447_s16 = scalar_lea.hbm %s630_s6, 16 }
 0x20c   :  { %p448_p7 = scmp.ne.s32.totalorder %s630_s6, %s447_s16  ;;  %p451_p8 = scmp.lt.u32.totalorder %s447_s16, %s630_s6 }
 0x20e   :  { %p453_p9 = pnand %p451_p8, %p448_p7 }
 0x210   :  { %456 = shalt.err (!%p453_p9)
}
 0x211   :  { %322 = dma.vmem_to_hbm [thread:$0]  %s320_s4, 16, %s630_s6, [#allocation6]   ;;  %312 = vst.msk [vmem:[#allocation10] sm:$0x1] %vm298_vm8, %v311_v0 }
 0x212   :  { %s457_s23 = scalar_lea.vmem %s590_s9, 16  ;;  %s461_s24 = scalar_lea.vmem %s590_s9, 32 }
 0x213   :  { %p458_p10 = scmp.ne.s32.totalorder %s590_s9, %s457_s23  ;;  %p462_p11 = scmp.lt.s32.totalorder %s590_s9, %s590_s9 }
 0x214   :  { %p463_p12 = scmp.lt.s32.totalorder %s461_s24, %s457_s23 }
 0x216   :  { %p464_p13 = por %p463_p12, %p462_p11 }
 0x218   :  { %p465_p0 = pnand %p464_p13, %p458_p10 }
 0x21a   :  { %468 = shalt.err (!%p465_p0)
}
 0x21b   :  { %s469_s1 = scalar_lea.hbm %s631_s7, 16 }
 0x21c   :  { %p470_p1 = scmp.ne.s32.totalorder %s631_s7, %s469_s1  ;;  %p473_p2 = scmp.lt.u32.totalorder %s469_s1, %s631_s7 }
 0x21e   :  { %p475_p3 = pnand %p473_p2, %p470_p1 }
 0x220   :  { %478 = shalt.err (!%p475_p3)
}
 0x221   :  { %332 = dma.vmem_to_hbm [thread:$0]  %s590_s9, 16, %s631_s7, [#allocation11]  }
 0x222   :  { %483 = dma.done.wait [#allocation6], 16  }
 0x223   :  { %484 = vsyncadd [#allocation6], 4294967280 }
 0x224   :  { %485 = dma.done.wait [#allocation11], 16  }
 0x225   :  { %486 = vsyncadd [#allocation11], 4294967280 }
 0x226   :  { %339 = vsyncpa [#allocation5], 1 }
 0x227   :  { %340 = vsyncpa [#allocation8], 1 }
 0x228   :  { %341 = vsyncpa [#allocation6], 1 }
 0x229   :  { %342 = vsyncpa [#allocation11], 1 }

</bundles_post_ra>
